<compile_context>
chip_gen: v7x
topology: tpu7x:2x2x1
jax: 0.10.0
libtpu: 0.0.40
codegen_flags: <defaults>
</compile_context>

<pallas_src>
import math

import jax
import jax.numpy as jnp
from jax.experimental import pallas as pl
from jax.experimental.pallas import tpu as pltpu


def _round_up(a, b):
    return (a + b - 1) // b * b


def _head_kernel(eps):
    def kernel(x_ref, g_ref, b_ref, w_ref, wb_ref, o_ref):
        # x_ref block: (TM, D) rows of the flattened (B*T, D) input.
        x = x_ref[...].astype(jnp.float32)                        # (TM, D) f32

        # LayerNorm over the last dim (biased variance, matches nn.LayerNorm).
        mean = jnp.mean(x, axis=-1, keepdims=True)
        xc = x - mean
        var = jnp.mean(xc * xc, axis=-1, keepdims=True)
        inv = jax.lax.rsqrt(var + eps)
        feat = xc * inv * g_ref[...] + b_ref[...]                 # (TM, D) f32

        # All classifier heads fused into one lane-dense matmul:
        # bf16 MXU operands, f32 accumulation, f32 bias add.
        out = jnp.dot(feat.astype(jnp.bfloat16), w_ref[...],
                      preferred_element_type=jnp.float32) + wb_ref[...]
        o_ref[...] = out.astype(o_ref.dtype)

    return kernel


def classification_head(x, gamma, beta, weights, biases, *, eps=1e-6,
                        row_tile=256):
    """x: (B, T, D). weights[i]: (num_class_i, D), biases[i]: (num_class_i,).

    Returns a list of logits tensors, one per head: (B, T, num_class_i)."""
    B, T, D = x.shape
    num_classes = [int(w.shape[0]) for w in weights]
    n_total = sum(num_classes)
    n_pad = max(128, _round_up(n_total, 128))          # lane-dense output width

    # Fuse all heads into one (D, n_pad) weight (bf16) and (1, n_pad) bias (f32).
    w_cat = jnp.concatenate([w.T for w in weights], axis=1)       # (D, n_total)
    w_all = jnp.pad(w_cat, ((0, 0), (0, n_pad - n_total))).astype(jnp.bfloat16)
    b_cat = jnp.concatenate(biases)[None, :]                      # (1, n_total)
    b_all = jnp.pad(b_cat, ((0, 0), (0, n_pad - n_total))).astype(jnp.float32)

    g2 = gamma.reshape(1, D).astype(jnp.float32)
    bt2 = beta.reshape(1, D).astype(jnp.float32)

    # Flatten (B, T) -> rows; tile rows in large blocks (multiple of 8 sublanes).
    rows = B * T
    tm = min(row_tile, _round_up(rows, 8))
    rows_pad = _round_up(rows, tm)
    x2 = x.reshape(rows, D)
    if rows_pad != rows:
        x2 = jnp.pad(x2, ((0, rows_pad - rows), (0, 0)))

    grid = (rows_pad // tm,)

    out = pl.pallas_call(
        _head_kernel(eps),
        out_shape=jax.ShapeDtypeStruct((rows_pad, n_pad), x.dtype),
        grid_spec=pltpu.PrefetchScalarGridSpec(
            num_scalar_prefetch=0,
            grid=grid,
            in_specs=[
                pl.BlockSpec((tm, D), lambda i: (i, 0)),        # x rows
                pl.BlockSpec((1, D), lambda i: (0, 0)),         # gamma
                pl.BlockSpec((1, D), lambda i: (0, 0)),         # beta
                pl.BlockSpec((D, n_pad), lambda i: (0, 0)),     # fused W
                pl.BlockSpec((1, n_pad), lambda i: (0, 0)),     # fused bias
            ],
            out_specs=pl.BlockSpec((tm, n_pad), lambda i: (i, 0)),
        ),
        compiler_params=pltpu.CompilerParams(
            dimension_semantics=("parallel",)),
    )(x2, g2, bt2, w_all, b_all)

    # Strip row/class padding and split back into the per-head logits list.
    out = out[:rows, :n_total].reshape(B, T, n_total)
    logits = []
    off = 0
    for nc in num_classes:
        logits.append(out[:, :, off:off + nc])
        off += nc
    return logits


def _reference(x, gamma, beta, weights, biases, eps=1e-6):
    """Pure-JAX f32 reference mirroring the PyTorch forward."""
    mean = jnp.mean(x, axis=-1, keepdims=True)
    var = jnp.mean((x - mean) ** 2, axis=-1, keepdims=True)
    feat = (x - mean) / jnp.sqrt(var + eps) * gamma + beta
    return [jnp.einsum("btd,cd->btc", feat, w) + b
            for w, b in zip(weights, biases)]


if __name__ == "__main__":
    B, T, D = 2, 8, 128            # large_dim = 128 (lane-dense)
    num_classes = (10, 3, 7)

    key = jax.random.PRNGKey(0)
    ks = jax.random.split(key, 3 + 2 * len(num_classes))
    x = jax.random.normal(ks[0], (B, T, D), jnp.float32)
    gamma = 1.0 + 0.1 * jax.random.normal(ks[1], (D,), jnp.float32)
    beta = 0.1 * jax.random.normal(ks[2], (D,), jnp.float32)

    bound = 1.0 / math.sqrt(D)
    weights, biases = [], []
    for i, nc in enumerate(num_classes):
        weights.append(jax.random.uniform(ks[3 + 2 * i], (nc, D),
                                          jnp.float32, -bound, bound))
        biases.append(jax.random.uniform(ks[4 + 2 * i], (nc,),
                                         jnp.float32, -bound, bound))

    logits = classification_head(x, gamma, beta, weights, biases)
    logits = jax.block_until_ready(logits)

    refs = _reference(x, gamma, beta, weights, biases)
    assert len(logits) == len(num_classes)
    for out, ref, nc in zip(logits, refs, num_classes):
        assert out.shape == (B, T, nc)
        # bf16 MXU operands with f32 accumulation -> slightly looser tolerance.
        assert jnp.allclose(out, ref, atol=2e-2, rtol=2e-2), "mismatch vs reference"

    print("KERNEL_OK")
</pallas_src>

<mosaic_0001>
module attributes {stable_mosaic.version = 11 : i64} {
  func.func @kernel(%arg0: i32, %arg1: memref<16x128xf32, #tpu.memory_space<vmem>>, %arg2: memref<1x128xf32, #tpu.memory_space<vmem>>, %arg3: memref<1x128xf32, #tpu.memory_space<vmem>>, %arg4: memref<128x128xbf16, #tpu.memory_space<vmem>>, %arg5: memref<1x128xf32, #tpu.memory_space<vmem>>, %arg6: memref<16x128xf32, #tpu.memory_space<vmem>>) attributes {dimension_semantics = [#tpu.dimension_semantics<parallel>], iteration_bounds = array<i64: 1>, scalar_prefetch = 0 : i64, scratch_operands = 0 : i64, tpu.core_type = #tpu.core_type<tc>, window_params = [{transform_indices = @transform_0, window_bounds = array<i64: 16, 128>}, {pipeline_mode = #tpu.pipeline_mode<synchronous>, transform_indices = @transform_1, window_bounds = array<i64: 1, 128>}, {pipeline_mode = #tpu.pipeline_mode<synchronous>, transform_indices = @transform_2, window_bounds = array<i64: 1, 128>}, {pipeline_mode = #tpu.pipeline_mode<synchronous>, transform_indices = @transform_3, window_bounds = array<i64: 128, 128>}, {pipeline_mode = #tpu.pipeline_mode<synchronous>, transform_indices = @transform_4, window_bounds = array<i64: 1, 128>}, {transform_indices = @transform_5, window_bounds = array<i64: 16, 128>}]} {
    %c0 = arith.constant 0 : index
    %c0_0 = arith.constant 0 : index
    %0 = vector.load %arg1[%c0, %c0_0] : memref<16x128xf32, #tpu.memory_space<vmem>>, vector<16x128xf32>
    %cst = arith.constant dense<0.000000e+00> : vector<16xf32>
    %1 = vector.multi_reduction <add>, %0, %cst [1] : vector<16x128xf32> to vector<16xf32>
    %2 = vector.shape_cast %1 : vector<16xf32> to vector<16x1xf32>
    %cst_1 = arith.constant 1.280000e+02 : f32
    %3 = vector.broadcast %cst_1 : f32 to vector<16x1xf32>
    %4 = arith.divf %2, %3 : vector<16x1xf32>
    %5 = vector.broadcast %4 : vector<16x1xf32> to vector<16x128xf32>
    %6 = arith.subf %0, %5 : vector<16x128xf32>
    %7 = arith.mulf %6, %6 : vector<16x128xf32>
    %cst_2 = arith.constant dense<0.000000e+00> : vector<16xf32>
    %8 = vector.multi_reduction <add>, %7, %cst_2 [1] : vector<16x128xf32> to vector<16xf32>
    %9 = vector.shape_cast %8 : vector<16xf32> to vector<16x1xf32>
    %cst_3 = arith.constant 1.280000e+02 : f32
    %10 = vector.broadcast %cst_3 : f32 to vector<16x1xf32>
    %11 = arith.divf %9, %10 : vector<16x1xf32>
    %cst_4 = arith.constant 9.99999997E-7 : f32
    %12 = vector.broadcast %cst_4 : f32 to vector<16x1xf32>
    %13 = arith.addf %11, %12 : vector<16x1xf32>
    %14 = math.rsqrt %13 : vector<16x1xf32>
    %15 = vector.broadcast %14 : vector<16x1xf32> to vector<16x128xf32>
    %16 = arith.mulf %6, %15 : vector<16x128xf32>
    %c0_5 = arith.constant 0 : index
    %c0_6 = arith.constant 0 : index
    %17 = vector.load %arg2[%c0_5, %c0_6] : memref<1x128xf32, #tpu.memory_space<vmem>>, vector<1x128xf32>
    %18 = vector.broadcast %17 : vector<1x128xf32> to vector<16x128xf32>
    %19 = arith.mulf %16, %18 : vector<16x128xf32>
    %c0_7 = arith.constant 0 : index
    %c0_8 = arith.constant 0 : index
    %20 = vector.load %arg3[%c0_7, %c0_8] : memref<1x128xf32, #tpu.memory_space<vmem>>, vector<1x128xf32>
    %21 = vector.broadcast %20 : vector<1x128xf32> to vector<16x128xf32>
    %22 = arith.addf %19, %21 : vector<16x128xf32>
    %23 = arith.truncf %22 : vector<16x128xf32> to vector<16x128xbf16>
    %c0_9 = arith.constant 0 : index
    %c0_10 = arith.constant 0 : index
    %24 = vector.load %arg4[%c0_9, %c0_10] : memref<128x128xbf16, #tpu.memory_space<vmem>>, vector<128x128xbf16>
    %cst_11 = arith.constant dense<0.000000e+00> : vector<16x128xf32>
    %25 = tpu.matmul %23, %24, %cst_11 {dimension_numbers = #tpu.dot_dimension_numbers<[1], [0], [0], [1], [0, 0, 1, 1], [], []>} : vector<16x128xbf16>, vector<128x128xbf16>, vector<16x128xf32> -> vector<16x128xf32>
    %c0_12 = arith.constant 0 : index
    %c0_13 = arith.constant 0 : index
    %26 = vector.load %arg5[%c0_12, %c0_13] : memref<1x128xf32, #tpu.memory_space<vmem>>, vector<1x128xf32>
    %27 = vector.broadcast %26 : vector<1x128xf32> to vector<16x128xf32>
    %28 = arith.addf %25, %27 : vector<16x128xf32>
    %c0_14 = arith.constant 0 : index
    %c0_15 = arith.constant 0 : index
    %29 = vector.load %arg6[%c0_14, %c0_15] : memref<16x128xf32, #tpu.memory_space<vmem>>, vector<16x128xf32>
    tpu.vector_store %arg6[%c0_14, %c0_15], %28 {strides = array<i32>} : memref<16x128xf32, #tpu.memory_space<vmem>>, vector<16x128xf32>,
    return
  }
  func.func @transform_0(%arg0: i32) -> (i32, i32) {
    %c0_i32 = arith.constant 0 : i32
    %c0_i32_0 = arith.constant 0 : i32
    return %arg0, %c0_i32 : i32, i32
  }
  func.func @transform_1(%arg0: i32) -> (i32, i32) {
    %c0_i32 = arith.constant 0 : i32
    %c0_i32_0 = arith.constant 0 : i32
    %c0_i32_1 = arith.constant 0 : i32
    return %c0_i32, %c0_i32_0 : i32, i32
  }
  func.func @transform_2(%arg0: i32) -> (i32, i32) {
    %c0_i32 = arith.constant 0 : i32
    %c0_i32_0 = arith.constant 0 : i32
    %c0_i32_1 = arith.constant 0 : i32
    return %c0_i32, %c0_i32_0 : i32, i32
  }
  func.func @transform_3(%arg0: i32) -> (i32, i32) {
    %c0_i32 = arith.constant 0 : i32
    %c0_i32_0 = arith.constant 0 : i32
    %c0_i32_1 = arith.constant 0 : i32
    return %c0_i32, %c0_i32_0 : i32, i32
  }
  func.func @transform_4(%arg0: i32) -> (i32, i32) {
    %c0_i32 = arith.constant 0 : i32
    %c0_i32_0 = arith.constant 0 : i32
    %c0_i32_1 = arith.constant 0 : i32
    return %c0_i32, %c0_i32_0 : i32, i32
  }
  func.func @transform_5(%arg0: i32) -> (i32, i32) {
    %c0_i32 = arith.constant 0 : i32
    %c0_i32_0 = arith.constant 0 : i32
    return %arg0, %c0_i32 : i32, i32
  }
}

</mosaic_0001>

<bundles_post_ra>
// kernel: tpu_custom_call.1
= control target key start
LH: loop header
LB: loop body
LE: loop exit
PB: predicated region body
PF: predicated region fallthrough
CT: control target
= control target key end

     0   :  { %10 = vsyncpa [#allocation3], 0  ;;  %s449_s0 = inlined_call_operand.hbm [shape: f32[16,128], index: 0, kind: input, shape index: {}]   ;;  %s450_s1 = inlined_call_operand.vmem [shape: f32[1,128], index: 1, kind: input, shape index: {}]   ;;  %s451_s2 = inlined_call_operand.vmem [shape: f32[1,128], index: 2, kind: input, shape index: {}]   ;;  %s452_s3 = inlined_call_operand.hbm [shape: bf16[128,128], index: 3, kind: input, shape index: {}]   ;;  %s453_s4 = inlined_call_operand.vmem [shape: f32[1,128], index: 4, kind: input, shape index: {}]   ;;  %s454_s5 = inlined_call_operand.hbm [shape: f32[16,128], index: 5, kind: output, shape index: {}]  }
   0x1   :  { %11 = vsyncpa [#allocation6], 0 }
   0x2   :  { %12 = vsyncpa [#allocation4], 0  ;;  %s359_s18 = smov [#allocation2]   ;;  %s287_s22 = scalar_lea.hbm %s449_s0, 256 }
   0x3   :  { %s18_s19 = sshll.u32 %s359_s18, 4  ;;  %p288_p0 = scmp.ne.s32.totalorder %s449_s0, %s287_s22  ;;  %s19_s19 = int_to_ptr.vmem [resolvable:$true] %s18_s19 }
   0x4   :  { %p291_p1 = scmp.lt.u32.totalorder %s287_s22, %s449_s0 }
   0x6   :  { %p293_p2 = pnand %p291_p1, %p288_p0 }
   0x8   :  { %296 = shalt.err (!%p293_p2)
}
   0x9   :  { %s297_s27 = scalar_lea.vmem %s19_s19, 256  ;;  %p302_p4 = scmp.lt.s32.totalorder %s19_s19, %s19_s19 }
   0xa   :  { %p298_p3 = scmp.ne.s32.totalorder %s19_s19, %s297_s27  ;;  %p303_p5 = scmp.lt.s32.totalorder %s297_s27, %s297_s27 }
   0xc   :  { %p304_p6 = por %p303_p5, %p302_p4 }
   0xe   :  { %p305_p7 = pnand %p304_p6, %p298_p3 }
  0x10   :  { %308 = shalt.err (!%p305_p7)
}
  0x11   :  { %s360_s28 = smov 128   ;;  %s361_s29 = smov 8  }
  0x12   :  { %24 = dma.hbm_to_vmem [thread:$0]  %s449_s0, 256, %s19_s19, [#allocation3], %s360_s28, %s360_s28, %s361_s29  }
  0x13   :  { %s362_s7 = smov [#allocation5]   ;;  %s309_s11 = scalar_lea.hbm %s452_s3, 1024 }
  0x14   :  { %s34_s8 = sshll.u32 %s362_s7, 4  ;;  %p310_p8 = scmp.ne.s32.totalorder %s452_s3, %s309_s11  ;;  %s35_s8 = int_to_ptr.vmem [resolvable:$true] %s34_s8 }
  0x15   :  { %p313_p9 = scmp.lt.u32.totalorder %s309_s11, %s452_s3 }
  0x17   :  { %p315_p10 = pnand %p313_p9, %p310_p8 }
  0x19   :  { %318 = shalt.err (!%p315_p10)
}
  0x1a   :  { %s319_s16 = scalar_lea.vmem %s35_s8, 1024  ;;  %p324_p12 = scmp.lt.s32.totalorder %s35_s8, %s35_s8 }
  0x1b   :  { %p320_p11 = scmp.ne.s32.totalorder %s35_s8, %s319_s16  ;;  %p325_p13 = scmp.lt.s32.totalorder %s319_s16, %s319_s16 }
  0x1d   :  { %p326_p0 = por %p325_p13, %p324_p12 }
  0x1f   :  { %p327_p1 = pnand %p326_p0, %p320_p11 }
  0x21   :  { %330 = shalt.err (!%p327_p1)
}
  0x22   :  { %s363_s0 = smov 64   ;;  %s364_s17 = smov 4  }
  0x23   :  { %40 = dma.hbm_to_vmem [thread:$0]  %s452_s3, 1024, %s35_s8, [#allocation6], %s363_s0, %s363_s0, %s364_s17  }
  0x24   :  { %353 = dma.done.wait [#allocation3], 256  }
  0x25   :  { %354 = vsyncadd [#allocation3], 4294967040 }
  0x26   :  { %355 = dma.done.wait [#allocation6], 1024  }
  0x27   :  { %356 = vsyncadd [#allocation6], 4294966272  ;;  %v50_v0 = vld [vmem:[#allocation2] sm:$0xff]  ;;  %v51_v1 = vld [vmem:[#allocation2 + $0x8] sm:$0xff]  ;;  %v365_v3 = vmov 0.0   ;;  %vm366_vm0 = vmmov 0  }
  0x28   :  { %52 = vadd.xlane.f32.xlu0 %v50_v0  ;;  %v275_v2 = vld [vmem:[#allocation5] sm:$0xff]   ;;  %246 = vmatprep.subr.bf16.mxu0 %v365_v3  ;;  %v276_v12 = vld [vmem:[#allocation5 + $0x8] sm:$0xff]   ;;  %v277_v13 = vld [vmem:[#allocation5 + $0x10] sm:$0xff]   ;;  %s367_s25 = smov [#allocation7]  }
  0x29   :  { %247 = vmatpush3.bf16.msra.mxu0 %v275_v2  ;;  %v278_v14 = vld [vmem:[#allocation5 + $0x18] sm:$0xff]   ;;  %v279_v15 = vld [vmem:[#allocation5 + $0x20] sm:$0xff]   ;;  %262 = vmatprep.mubr.msk.bf16.mxu0 %vm366_vm0, %v365_v3  ;;  %v280_v16 = vld [vmem:[#allocation5 + $0x28] sm:$0xff]   ;;  %s213_s26 = sshll.u32 %s367_s25, 4  ;;  %s214_s26 = int_to_ptr.vmem [resolvable:$true] %s213_s26 }
  0x2a   :  { %248 = vmatprep.subr.bf16.mxu0 %v365_v3  ;;  %v281_v17 = vld [vmem:[#allocation5 + $0x30] sm:$0xff]   ;;  %v282_v18 = vld [vmem:[#allocation5 + $0x38] sm:$0xff]   ;;  %p336_p3 = scmp.lt.s32.totalorder %s214_s26, %s214_s26 }
  0x2b   :  { %v226_v27 = vld [vmem:[%s450_s1] ss:$0 sm:$0xff]  ;;  %s331_s1 = scalar_lea.vmem %s214_s26, 256 }
  0x2c   :  { %54 = vadd.xlane.f32.xlu0 %v51_v1  ;;  %v227_v31 = vld [vmem:[%s451_s2] ss:$0 sm:$0xff]  ;;  %p332_p2 = scmp.ne.s32.totalorder %s214_s26, %s331_s1  ;;  %p337_p4 = scmp.lt.s32.totalorder %s331_s1, %s331_s1 }
  0x2d   :  { %249 = vmatpush3.bf16.msra.mxu0 %v276_v12  ;;  %v228_v36 = vld [vmem:[%s453_s4] ss:$0 sm:$0xff] }
  0x2e   :  { %250 = vmatprep.subr.bf16.mxu0 %v365_v3  ;;  %p338_p5 = por %p337_p4, %p336_p3 }
  0x30   :  { %p339_p6 = pnand %p338_p5, %p332_p2 }
  0x31   :  { %251 = vmatpush3.bf16.msra.mxu0 %v277_v13 }
  0x32   :  { %252 = vmatprep.subr.bf16.mxu0 %v365_v3 }
  0x35   :  { %253 = vmatpush3.bf16.msra.mxu0 %v278_v14 }
  0x36   :  { %254 = vmatprep.subr.bf16.mxu0 %v365_v3 }
  0x39   :  { %255 = vmatpush3.bf16.msra.mxu0 %v279_v15 }
  0x3a   :  { %256 = vmatprep.subr.bf16.mxu0 %v365_v3 }
  0x3d   :  { %257 = vmatpush3.bf16.msra.mxu0 %v280_v16 }
  0x3e   :  { %258 = vmatprep.subr.bf16.mxu0 %v365_v3 }
  0x41   :  { %259 = vmatpush3.bf16.msra.mxu0 %v281_v17 }
  0x42   :  { %260 = vmatprep.subr.bf16.mxu0 %v365_v3 }
  0x45   :  { %261 = vmatpush3.bf16.msra.mxu0 %v282_v18 }
  0xb5   :  { %v53_v4 = vpop.xlane.xlu0 %52 }
  0xb6   :  { %v57_v5 = vmul.f32 0.0078125, %v53_v4 }
  0xb8   :  { %v59_v6 = vsub.f32 %v50_v0, %v57_v5 }
  0xb9   :  { %v55_v7 = vpop.xlane.xlu0 %54 }
  0xba   :  { %v58_v8 = vmul.f32 0.0078125, %v55_v7  ;;  %v61_v9 = vmul.f32 %v59_v6, %v59_v6 }
  0xbc   :  { %v60_v10 = vsub.f32 %v51_v1, %v58_v8  ;;  %63 = vadd.xlane.f32.xlu1 %v61_v9 }
  0xbe   :  { %v62_v11 = vmul.f32 %v60_v10, %v60_v10 }
  0xc0   :  { %65 = vadd.xlane.f32.xlu1 %v62_v11 }
 0x149   :  { %v64_v19 = vpop.xlane.xlu1 %63 }
 0x14a   :  { %v67_v20 = vmul.f32 0.0078125, %v64_v19 }
 0x14c   :  { %v69_v21 = vadd.f32 1e-06, %v67_v20 }
 0x14d   :  { %v66_v22 = vpop.xlane.xlu1 %65 }
 0x14e   :  { %283 = vrsqrt.f32 %v69_v21  ;;  %v68_v23 = vmul.f32 0.0078125, %v66_v22 }
 0x150   :  { %v70_v24 = vadd.f32 1e-06, %v68_v23 }
 0x152   :  { %285 = vrsqrt.f32 %v70_v24 }
 0x158   :  { %v284_v25 = vpop.eup %283 }
 0x159   :  { %v73_v26 = vmul.f32 %v284_v25, %v59_v6 }
 0x15b   :  { %v82_v30 = vmul.f32 %v226_v27, %v73_v26 }
 0x15c   :  { %v286_v28 = vpop.eup %285 }
 0x15d   :  { %v74_v29 = vmul.f32 %v286_v28, %v60_v10  ;;  %v91_v33 = vadd.f32 %v227_v31, %v82_v30 }
 0x15f   :  { %v83_v32 = vmul.f32 %v226_v27, %v74_v29 }
 0x161   :  { %v92_v34 = vadd.f32 %v227_v31, %v83_v32 }
 0x163   :  { %v93_v35 = vpack.c.bf16 %v92_v34, %v91_v33 }
 0x165   :  { %263 = vmatmul.mubr.bf16.vlgmr.msra.gmra.mrb[0].mxu0 %v93_v35 }
 0x238   :  { %v199_v37 = vpop.f32.mrb[0].mxu0 }
 0x239   :  { %v200_v38 = vadd.f32 %v228_v36, %v199_v37  ;;  %v264_v39 = vpop.f32.mrb[1].mxu0 }
 0x23a   :  { %v202_v40 = vpop.f32.mrb[2].mxu0 }
 0x23b   :  { %206 = vst [vmem:[#allocation7] sm:$0xff] %v200_v38  ;;  %v203_v41 = vadd.f32 %v228_v36, %v202_v40  ;;  %v265_v42 = vpop.f32.mrb[3].mxu0 }
 0x23d   :  { %207 = vst [vmem:[#allocation7 + $0x8] sm:$0xff] %v203_v41 }
 0x23e   :  { %342 = shalt.err (!%p339_p6)
}
 0x23f   :  { %s343_s27 = scalar_lea.hbm %s454_s5, 256 }
 0x240   :  { %p344_p7 = scmp.ne.s32.totalorder %s454_s5, %s343_s27  ;;  %p347_p8 = scmp.lt.u32.totalorder %s343_s27, %s454_s5 }
 0x242   :  { %p349_p9 = pnand %p347_p8, %p344_p7 }
 0x244   :  { %352 = shalt.err (!%p349_p9)
}
 0x245   :  { %219 = dma.vmem_to_hbm [thread:$0]  %s214_s26, 256, %s454_s5, [#allocation4], %s360_s28, %s360_s28, %s361_s29  }
 0x246   :  { %357 = dma.done.wait [#allocation4], 256  }
 0x247   :  { %358 = vsyncadd [#allocation4], 4294967040 }
 0x248   :  { %223 = vsyncpa [#allocation3], 1 }
 0x249   :  { %224 = vsyncpa [#allocation6], 1 }
 0x24a   :  { %225 = vsyncpa [#allocation4], 1 }

</bundles_post_ra>
